<compile_context>
chip_gen: v7x
topology: tpu7x:2x2x1
jax: 0.10.0
libtpu: 0.0.40
codegen_flags: <defaults>
</compile_context>

<pallas_src>
import jax
import jax.numpy as jnp
from jax.experimental import pallas as pl
from jax.experimental.pallas import tpu as pltpu

_EPS = 1e-12            # torch.nn.functional.normalize default eps
_EPS_SQ = _EPS * _EPS   # clamp applied to the squared norm (sqrt is monotonic)


def _make_aggregate_kernel(num_attributes: int):
    A = num_attributes

    def kernel(*refs):
        att_refs = refs[:A]        # A x (TB, D) raw attribute features
        x_ref = refs[A]            # (TB, D) raw query features
        o_ref = refs[A + 1]        # (TB, D) aggregated output

        # F.normalize(x): x / max(||x||, eps) == x * rsqrt(max(||x||^2, eps^2))
        x = x_ref[...].astype(jnp.float32)
        xn = x * jax.lax.rsqrt(
            jnp.maximum(jnp.sum(x * x, axis=-1, keepdims=True), _EPS_SQ))

        # Pass 1: per-attribute inverse norms and attention logits.
        #   score_i = <normalize(a_i), xn> = inv_norm_i * <a_i, xn>
        inv_norms = []
        scores = []
        for i in range(A):
            a = att_refs[i][...].astype(jnp.float32)
            inv_n = jax.lax.rsqrt(
                jnp.maximum(jnp.sum(a * a, axis=-1, keepdims=True), _EPS_SQ))
            inv_norms.append(inv_n)                                    # (TB, 1)
            scores.append(jnp.sum(a * xn, axis=-1, keepdims=True) * inv_n)

        # Softmax over the attribute axis, kept as A separate (TB, 1) columns
        # (pure VPU max/exp/add chain -- no narrow-lane concatenate needed).
        m = scores[0]
        for i in range(1, A):
            m = jnp.maximum(m, scores[i])
        exps = [jnp.exp(s - m) for s in scores]
        den = exps[0]
        for i in range(1, A):
            den = den + exps[i]
        inv_den = pl.reciprocal(den, approx=True)                      # EUP slot

        # Pass 2: out = sum_i softmax_i * normalize(a_i)
        #             = sum_i (softmax_i * inv_norm_i) * a_i   (VPU fma loop)
        out = (exps[0] * inv_den * inv_norms[0]) * att_refs[0][...].astype(jnp.float32)
        for i in range(1, A):
            w = exps[i] * inv_den * inv_norms[i]
            out = out + w * att_refs[i][...].astype(jnp.float32)

        o_ref[...] = out.astype(o_ref.dtype)

    return kernel


def attribute_aggregate(x, attribute_feat, *, block_b: int = 1024):
    """Aggregate attribute features via normalized-cosine softmax attention.

    x:              [B, D] query features.
    attribute_feat: list of A arrays, each [B, D] (one per attribute head).
                    They are fed to the kernel as A separate inputs -- no
                    [B, A, D] stack / HBM round-trip.
    Returns:        [B, D] in the dtype of `x`.

    Note: unlike torch's .squeeze(), the batch dim is kept even when B == 1.
    """
    A = len(attribute_feat)
    B, D = x.shape
    for f in attribute_feat:
        assert f.shape == (B, D), f"attribute feature shape {f.shape} != {(B, D)}"

    # Batch tile: big enough to amortize per-step overhead and hit the HBM
    # roofline, small enough for v7x's VMEM (double-buffered (A+1) inputs +
    # output + f32 temporaries). TB must be a multiple of 8 or equal B.
    tb = min(block_b, B)
    if tb != B:
        tb = max(8, (tb // 8) * 8)
    grid = (pl.cdiv(B, tb),)

    spec = pl.BlockSpec((tb, D), lambda i: (i, 0))
    grid_spec = pl.GridSpec(
        grid=grid,
        in_specs=[spec] * (A + 1),
        out_specs=spec,
    )

    return pl.pallas_call(
        _make_aggregate_kernel(A),
        out_shape=jax.ShapeDtypeStruct((B, D), x.dtype),
        grid_spec=grid_spec,
        compiler_params=pltpu.CompilerParams(
            dimension_semantics=("parallel",),   # megacore-shard the batch grid
        ),
    )(*attribute_feat, x)


def _reference(x, attribute_feat):
    """Pure-JAX reference mirroring the PyTorch aggregation branch."""
    def l2n(v):
        n = jnp.sqrt(jnp.sum(v * v, axis=-1, keepdims=True))
        return v / jnp.maximum(n, _EPS)

    a = jnp.stack([l2n(f) for f in attribute_feat], axis=1)            # [B, A, D]
    b = l2n(x)[:, :, None]                                             # [B, D, 1]
    ab = jax.nn.softmax(jnp.einsum("bad,bdk->bak", a, b), axis=1)      # [B, A, 1]
    out = jnp.einsum("bda,bak->bdk", jnp.swapaxes(a, 1, 2), ab)        # [B, D, 1]
    return jnp.squeeze(out, axis=-1)                                   # [B, D]


if __name__ == "__main__":
    # Small shapes consistent with the forward: batch=4, attributes=5, hidden=128.
    B, A, D = 4, 5, 128
    key = jax.random.PRNGKey(0)
    kx, *katts = jax.random.split(key, A + 1)

    x = jax.random.normal(kx, (B, D), dtype=jnp.float32)
    attribute_feat = [jax.random.normal(k, (B, D), dtype=jnp.float32) for k in katts]

    out = attribute_aggregate(x, attribute_feat)
    out = jax.block_until_ready(out)

    ref = _reference(x, attribute_feat)
    assert out.shape == (B, D)
    # Slightly looser tolerance: the softmax denominator uses the EUP
    # approximate reciprocal (pl.reciprocal(approx=True)).
    assert jnp.allclose(out, ref, atol=2e-3, rtol=2e-3), "mismatch vs reference"

    print("KERNEL_OK")
</pallas_src>

<mosaic_0001>
module attributes {stable_mosaic.version = 11 : i64} {
  func.func @kernel(%arg0: i32, %arg1: memref<4x128xf32, #tpu.memory_space<vmem>>, %arg2: memref<4x128xf32, #tpu.memory_space<vmem>>, %arg3: memref<4x128xf32, #tpu.memory_space<vmem>>, %arg4: memref<4x128xf32, #tpu.memory_space<vmem>>, %arg5: memref<4x128xf32, #tpu.memory_space<vmem>>, %arg6: memref<4x128xf32, #tpu.memory_space<vmem>>, %arg7: memref<4x128xf32, #tpu.memory_space<vmem>>) attributes {dimension_semantics = [#tpu.dimension_semantics<parallel>], iteration_bounds = array<i64: 1>, scalar_prefetch = 0 : i64, scratch_operands = 0 : i64, tpu.core_type = #tpu.core_type<tc>, window_params = [{transform_indices = @transform_0, window_bounds = array<i64: 4, 128>}, {transform_indices = @transform_1, window_bounds = array<i64: 4, 128>}, {transform_indices = @transform_2, window_bounds = array<i64: 4, 128>}, {transform_indices = @transform_3, window_bounds = array<i64: 4, 128>}, {transform_indices = @transform_4, window_bounds = array<i64: 4, 128>}, {transform_indices = @transform_5, window_bounds = array<i64: 4, 128>}, {transform_indices = @transform_6, window_bounds = array<i64: 4, 128>}]} {
    %c0 = arith.constant 0 : index
    %c0_0 = arith.constant 0 : index
    %0 = vector.load %arg6[%c0, %c0_0] : memref<4x128xf32, #tpu.memory_space<vmem>>, vector<4x128xf32>
    %1 = arith.mulf %0, %0 : vector<4x128xf32>
    %cst = arith.constant dense<0.000000e+00> : vector<4xf32>
    %2 = vector.multi_reduction <add>, %1, %cst [1] : vector<4x128xf32> to vector<4xf32>
    %3 = vector.shape_cast %2 : vector<4xf32> to vector<4x1xf32>
    %cst_1 = arith.constant 1.000000e-24 : f32
    %4 = vector.broadcast %cst_1 : f32 to vector<4x1xf32>
    %5 = arith.maximumf %3, %4 : vector<4x1xf32>
    %6 = math.rsqrt %5 : vector<4x1xf32>
    %7 = vector.broadcast %6 : vector<4x1xf32> to vector<4x128xf32>
    %8 = arith.mulf %0, %7 : vector<4x128xf32>
    %c0_2 = arith.constant 0 : index
    %c0_3 = arith.constant 0 : index
    %9 = vector.load %arg1[%c0_2, %c0_3] : memref<4x128xf32, #tpu.memory_space<vmem>>, vector<4x128xf32>
    %10 = arith.mulf %9, %9 : vector<4x128xf32>
    %cst_4 = arith.constant dense<0.000000e+00> : vector<4xf32>
    %11 = vector.multi_reduction <add>, %10, %cst_4 [1] : vector<4x128xf32> to vector<4xf32>
    %12 = vector.shape_cast %11 : vector<4xf32> to vector<4x1xf32>
    %cst_5 = arith.constant 1.000000e-24 : f32
    %13 = vector.broadcast %cst_5 : f32 to vector<4x1xf32>
    %14 = arith.maximumf %12, %13 : vector<4x1xf32>
    %15 = math.rsqrt %14 : vector<4x1xf32>
    %16 = arith.mulf %9, %8 : vector<4x128xf32>
    %cst_6 = arith.constant dense<0.000000e+00> : vector<4xf32>
    %17 = vector.multi_reduction <add>, %16, %cst_6 [1] : vector<4x128xf32> to vector<4xf32>
    %18 = vector.shape_cast %17 : vector<4xf32> to vector<4x1xf32>
    %19 = arith.mulf %18, %15 : vector<4x1xf32>
    %c0_7 = arith.constant 0 : index
    %c0_8 = arith.constant 0 : index
    %20 = vector.load %arg2[%c0_7, %c0_8] : memref<4x128xf32, #tpu.memory_space<vmem>>, vector<4x128xf32>
    %21 = arith.mulf %20, %20 : vector<4x128xf32>
    %cst_9 = arith.constant dense<0.000000e+00> : vector<4xf32>
    %22 = vector.multi_reduction <add>, %21, %cst_9 [1] : vector<4x128xf32> to vector<4xf32>
    %23 = vector.shape_cast %22 : vector<4xf32> to vector<4x1xf32>
    %cst_10 = arith.constant 1.000000e-24 : f32
    %24 = vector.broadcast %cst_10 : f32 to vector<4x1xf32>
    %25 = arith.maximumf %23, %24 : vector<4x1xf32>
    %26 = math.rsqrt %25 : vector<4x1xf32>
    %27 = arith.mulf %20, %8 : vector<4x128xf32>
    %cst_11 = arith.constant dense<0.000000e+00> : vector<4xf32>
    %28 = vector.multi_reduction <add>, %27, %cst_11 [1] : vector<4x128xf32> to vector<4xf32>
    %29 = vector.shape_cast %28 : vector<4xf32> to vector<4x1xf32>
    %30 = arith.mulf %29, %26 : vector<4x1xf32>
    %c0_12 = arith.constant 0 : index
    %c0_13 = arith.constant 0 : index
    %31 = vector.load %arg3[%c0_12, %c0_13] : memref<4x128xf32, #tpu.memory_space<vmem>>, vector<4x128xf32>
    %32 = arith.mulf %31, %31 : vector<4x128xf32>
    %cst_14 = arith.constant dense<0.000000e+00> : vector<4xf32>
    %33 = vector.multi_reduction <add>, %32, %cst_14 [1] : vector<4x128xf32> to vector<4xf32>
    %34 = vector.shape_cast %33 : vector<4xf32> to vector<4x1xf32>
    %cst_15 = arith.constant 1.000000e-24 : f32
    %35 = vector.broadcast %cst_15 : f32 to vector<4x1xf32>
    %36 = arith.maximumf %34, %35 : vector<4x1xf32>
    %37 = math.rsqrt %36 : vector<4x1xf32>
    %38 = arith.mulf %31, %8 : vector<4x128xf32>
    %cst_16 = arith.constant dense<0.000000e+00> : vector<4xf32>
    %39 = vector.multi_reduction <add>, %38, %cst_16 [1] : vector<4x128xf32> to vector<4xf32>
    %40 = vector.shape_cast %39 : vector<4xf32> to vector<4x1xf32>
    %41 = arith.mulf %40, %37 : vector<4x1xf32>
    %c0_17 = arith.constant 0 : index
    %c0_18 = arith.constant 0 : index
    %42 = vector.load %arg4[%c0_17, %c0_18] : memref<4x128xf32, #tpu.memory_space<vmem>>, vector<4x128xf32>
    %43 = arith.mulf %42, %42 : vector<4x128xf32>
    %cst_19 = arith.constant dense<0.000000e+00> : vector<4xf32>
    %44 = vector.multi_reduction <add>, %43, %cst_19 [1] : vector<4x128xf32> to vector<4xf32>
    %45 = vector.shape_cast %44 : vector<4xf32> to vector<4x1xf32>
    %cst_20 = arith.constant 1.000000e-24 : f32
    %46 = vector.broadcast %cst_20 : f32 to vector<4x1xf32>
    %47 = arith.maximumf %45, %46 : vector<4x1xf32>
    %48 = math.rsqrt %47 : vector<4x1xf32>
    %49 = arith.mulf %42, %8 : vector<4x128xf32>
    %cst_21 = arith.constant dense<0.000000e+00> : vector<4xf32>
    %50 = vector.multi_reduction <add>, %49, %cst_21 [1] : vector<4x128xf32> to vector<4xf32>
    %51 = vector.shape_cast %50 : vector<4xf32> to vector<4x1xf32>
    %52 = arith.mulf %51, %48 : vector<4x1xf32>
    %c0_22 = arith.constant 0 : index
    %c0_23 = arith.constant 0 : index
    %53 = vector.load %arg5[%c0_22, %c0_23] : memref<4x128xf32, #tpu.memory_space<vmem>>, vector<4x128xf32>
    %54 = arith.mulf %53, %53 : vector<4x128xf32>
    %cst_24 = arith.constant dense<0.000000e+00> : vector<4xf32>
    %55 = vector.multi_reduction <add>, %54, %cst_24 [1] : vector<4x128xf32> to vector<4xf32>
    %56 = vector.shape_cast %55 : vector<4xf32> to vector<4x1xf32>
    %cst_25 = arith.constant 1.000000e-24 : f32
    %57 = vector.broadcast %cst_25 : f32 to vector<4x1xf32>
    %58 = arith.maximumf %56, %57 : vector<4x1xf32>
    %59 = math.rsqrt %58 : vector<4x1xf32>
    %60 = arith.mulf %53, %8 : vector<4x128xf32>
    %cst_26 = arith.constant dense<0.000000e+00> : vector<4xf32>
    %61 = vector.multi_reduction <add>, %60, %cst_26 [1] : vector<4x128xf32> to vector<4xf32>
    %62 = vector.shape_cast %61 : vector<4xf32> to vector<4x1xf32>
    %63 = arith.mulf %62, %59 : vector<4x1xf32>
    %64 = arith.maximumf %19, %30 : vector<4x1xf32>
    %65 = arith.maximumf %64, %41 : vector<4x1xf32>
    %66 = arith.maximumf %65, %52 : vector<4x1xf32>
    %67 = arith.maximumf %66, %63 : vector<4x1xf32>
    %68 = arith.subf %19, %67 : vector<4x1xf32>
    %69 = math.exp %68 : vector<4x1xf32>
    %70 = arith.subf %30, %67 : vector<4x1xf32>
    %71 = math.exp %70 : vector<4x1xf32>
    %72 = arith.subf %41, %67 : vector<4x1xf32>
    %73 = math.exp %72 : vector<4x1xf32>
    %74 = arith.subf %52, %67 : vector<4x1xf32>
    %75 = math.exp %74 : vector<4x1xf32>
    %76 = arith.subf %63, %67 : vector<4x1xf32>
    %77 = math.exp %76 : vector<4x1xf32>
    %78 = arith.addf %69, %71 : vector<4x1xf32>
    %79 = arith.addf %78, %73 : vector<4x1xf32>
    %80 = arith.addf %79, %75 : vector<4x1xf32>
    %81 = arith.addf %80, %77 : vector<4x1xf32>
    %82 = tpu.reciprocal %81 {approx = true} : vector<4x1xf32> -> vector<4x1xf32>
    %83 = arith.mulf %69, %82 : vector<4x1xf32>
    %84 = arith.mulf %83, %15 : vector<4x1xf32>
    %c0_27 = arith.constant 0 : index
    %c0_28 = arith.constant 0 : index
    %85 = vector.load %arg1[%c0_27, %c0_28] : memref<4x128xf32, #tpu.memory_space<vmem>>, vector<4x128xf32>
    %86 = vector.broadcast %84 : vector<4x1xf32> to vector<4x128xf32>
    %87 = arith.mulf %86, %85 : vector<4x128xf32>
    %88 = arith.mulf %71, %82 : vector<4x1xf32>
    %89 = arith.mulf %88, %26 : vector<4x1xf32>
    %c0_29 = arith.constant 0 : index
    %c0_30 = arith.constant 0 : index
    %90 = vector.load %arg2[%c0_29, %c0_30] : memref<4x128xf32, #tpu.memory_space<vmem>>, vector<4x128xf32>
    %91 = vector.broadcast %89 : vector<4x1xf32> to vector<4x128xf32>
    %92 = arith.mulf %91, %90 : vector<4x128xf32>
    %93 = arith.addf %87, %92 : vector<4x128xf32>
    %94 = arith.mulf %73, %82 : vector<4x1xf32>
    %95 = arith.mulf %94, %37 : vector<4x1xf32>
    %c0_31 = arith.constant 0 : index
    %c0_32 = arith.constant 0 : index
    %96 = vector.load %arg3[%c0_31, %c0_32] : memref<4x128xf32, #tpu.memory_space<vmem>>, vector<4x128xf32>
    %97 = vector.broadcast %95 : vector<4x1xf32> to vector<4x128xf32>
    %98 = arith.mulf %97, %96 : vector<4x128xf32>
    %99 = arith.addf %93, %98 : vector<4x128xf32>
    %100 = arith.mulf %75, %82 : vector<4x1xf32>
    %101 = arith.mulf %100, %48 : vector<4x1xf32>
    %c0_33 = arith.constant 0 : index
    %c0_34 = arith.constant 0 : index
    %102 = vector.load %arg4[%c0_33, %c0_34] : memref<4x128xf32, #tpu.memory_space<vmem>>, vector<4x128xf32>
    %103 = vector.broadcast %101 : vector<4x1xf32> to vector<4x128xf32>
    %104 = arith.mulf %103, %102 : vector<4x128xf32>
    %105 = arith.addf %99, %104 : vector<4x128xf32>
    %106 = arith.mulf %77, %82 : vector<4x1xf32>
    %107 = arith.mulf %106, %59 : vector<4x1xf32>
    %c0_35 = arith.constant 0 : index
    %c0_36 = arith.constant 0 : index
    %108 = vector.load %arg5[%c0_35, %c0_36] : memref<4x128xf32, #tpu.memory_space<vmem>>, vector<4x128xf32>
    %109 = vector.broadcast %107 : vector<4x1xf32> to vector<4x128xf32>
    %110 = arith.mulf %109, %108 : vector<4x128xf32>
    %111 = arith.addf %105, %110 : vector<4x128xf32>
    %c0_37 = arith.constant 0 : index
    %c0_38 = arith.constant 0 : index
    %112 = vector.load %arg7[%c0_37, %c0_38] : memref<4x128xf32, #tpu.memory_space<vmem>>, vector<4x128xf32>
    tpu.vector_store %arg7[%c0_37, %c0_38], %111 {strides = array<i32>} : memref<4x128xf32, #tpu.memory_space<vmem>>, vector<4x128xf32>,
    return
  }
  func.func @transform_0(%arg0: i32) -> (i32, i32) {
    %c0_i32 = arith.constant 0 : i32
    %c0_i32_0 = arith.constant 0 : i32
    return %arg0, %c0_i32 : i32, i32
  }
  func.func @transform_1(%arg0: i32) -> (i32, i32) {
    %c0_i32 = arith.constant 0 : i32
    %c0_i32_0 = arith.constant 0 : i32
    return %arg0, %c0_i32 : i32, i32
  }
  func.func @transform_2(%arg0: i32) -> (i32, i32) {
    %c0_i32 = arith.constant 0 : i32
    %c0_i32_0 = arith.constant 0 : i32
    return %arg0, %c0_i32 : i32, i32
  }
  func.func @transform_3(%arg0: i32) -> (i32, i32) {
    %c0_i32 = arith.constant 0 : i32
    %c0_i32_0 = arith.constant 0 : i32
    return %arg0, %c0_i32 : i32, i32
  }
  func.func @transform_4(%arg0: i32) -> (i32, i32) {
    %c0_i32 = arith.constant 0 : i32
    %c0_i32_0 = arith.constant 0 : i32
    return %arg0, %c0_i32 : i32, i32
  }
  func.func @transform_5(%arg0: i32) -> (i32, i32) {
    %c0_i32 = arith.constant 0 : i32
    %c0_i32_0 = arith.constant 0 : i32
    return %arg0, %c0_i32 : i32, i32
  }
  func.func @transform_6(%arg0: i32) -> (i32, i32) {
    %c0_i32 = arith.constant 0 : i32
    %c0_i32_0 = arith.constant 0 : i32
    return %arg0, %c0_i32 : i32, i32
  }
}

</mosaic_0001>

<bundles_post_ra>
// kernel: tpu_custom_call.1
= control target key start
LH: loop header
LB: loop body
LE: loop exit
PB: predicated region body
PF: predicated region fallthrough
CT: control target
= control target key end

     0   :  { %11 = vsyncpa [#allocation3], 0  ;;  %s403_s0 = inlined_call_operand.hbm [shape: f32[4,128], index: 0, kind: input, shape index: {}]   ;;  %s404_s1 = inlined_call_operand.hbm [shape: f32[4,128], index: 1, kind: input, shape index: {}]   ;;  %s405_s2 = inlined_call_operand.vmem [shape: f32[4,128], index: 2, kind: input, shape index: {}]   ;;  %s406_s3 = inlined_call_operand.vmem [shape: f32[4,128], index: 3, kind: input, shape index: {}]   ;;  %s407_s4 = inlined_call_operand.vmem [shape: f32[4,128], index: 4, kind: input, shape index: {}]   ;;  %s408_s5 = inlined_call_operand.vmem [shape: f32[4,128], index: 5, kind: input, shape index: {}]   ;;  %s409_s6 = inlined_call_operand.hbm [shape: f32[4,128], index: 6, kind: output, shape index: {}]  }
   0x1   :  { %12 = vsyncpa [#allocation6], 0 }
   0x2   :  { %13 = vsyncpa [#allocation4], 0  ;;  %s276_s21 = smov [#allocation2]   ;;  %s277_s23 = smov [#allocation5]  }
   0x3   :  { %s20_s22 = sshll.u32 %s276_s21, 4  ;;  %s30_s24 = sshll.u32 %s277_s23, 4  ;;  %s21_s22 = int_to_ptr.vmem [resolvable:$true] %s20_s22  ;;  %s31_s24 = int_to_ptr.vmem [resolvable:$true] %s30_s24 }
   0x4   :  { %s204_s27 = scalar_lea.hbm %s403_s0, 64 }
   0x5   :  { %p205_p0 = scmp.ne.s32.totalorder %s403_s0, %s204_s27  ;;  %p208_p1 = scmp.lt.u32.totalorder %s204_s27, %s403_s0 }
   0x7   :  { %p210_p2 = pnand %p208_p1, %p205_p0 }
   0x9   :  { %213 = shalt.err (!%p210_p2)
}
   0xa   :  { %s214_s8 = scalar_lea.vmem %s21_s22, 64  ;;  %p219_p4 = scmp.lt.s32.totalorder %s21_s22, %s21_s22 }
   0xb   :  { %p215_p3 = scmp.ne.s32.totalorder %s21_s22, %s214_s8  ;;  %p220_p5 = scmp.lt.s32.totalorder %s214_s8, %s214_s8 }
   0xd   :  { %p221_p6 = por %p220_p5, %p219_p4 }
   0xf   :  { %p222_p7 = pnand %p221_p6, %p215_p3 }
  0x11   :  { %225 = shalt.err (!%p222_p7)
}
  0x12   :  { %23 = dma.hbm_to_vmem [thread:$0]  %s403_s0, 64, %s21_s22, [#allocation3]  }
  0x13   :  { %s226_s13 = scalar_lea.hbm %s404_s1, 64 }
  0x14   :  { %p227_p8 = scmp.ne.s32.totalorder %s404_s1, %s226_s13  ;;  %p230_p9 = scmp.lt.u32.totalorder %s226_s13, %s404_s1 }
  0x16   :  { %p232_p10 = pnand %p230_p9, %p227_p8 }
  0x18   :  { %235 = shalt.err (!%p232_p10)
}
  0x19   :  { %s236_s18 = scalar_lea.vmem %s31_s24, 64  ;;  %p241_p12 = scmp.lt.s32.totalorder %s31_s24, %s31_s24 }
  0x1a   :  { %p237_p11 = scmp.ne.s32.totalorder %s31_s24, %s236_s18  ;;  %p242_p13 = scmp.lt.s32.totalorder %s236_s18, %s236_s18 }
  0x1c   :  { %p243_p0 = por %p242_p13, %p241_p12 }
  0x1e   :  { %p244_p1 = pnand %p243_p0, %p237_p11 }
  0x20   :  { %247 = shalt.err (!%p244_p1)
}
  0x21   :  { %33 = dma.hbm_to_vmem [thread:$0]  %s404_s1, 64, %s31_s24, [#allocation6]  }
  0x22   :  { %270 = dma.done.wait [#allocation3], 64  }
  0x23   :  { %271 = vsyncadd [#allocation3], 4294967232 }
  0x24   :  { %272 = dma.done.wait [#allocation6], 64  }
  0x25   :  { %273 = vsyncadd [#allocation6], 4294967232  ;;  %v48_v0 = vld [vmem:[%s408_s5] sm:$0xf]  ;;  %vm50_vm0 = vcmask 1043456  }
  0x26   :  { %v49_v1 = vmul.f32 %v48_v0, %v48_v0  ;;  %v342_v3 = vld [vmem:[#allocation5] sm:$0xf]  ;;  %v344_v4 = vld [vmem:[#allocation2] sm:$0xf] }
  0x27   :  { %v70_v5 = vmul.f32 %v342_v3, %v342_v3  ;;  %v58_v6 = vmul.f32 %v344_v4, %v344_v4  ;;  %v355_v9 = vld [vmem:[%s405_s2] sm:$0xf] }
  0x28   :  { %v51_v2 = vsel %vm50_vm0, %v49_v1, 0.0  ;;  %v360_v10 = vld [vmem:[%s406_s3] sm:$0xf]  ;;  %v82_v11 = vmul.f32 %v355_v9, %v355_v9  ;;  %s278_s3 = smov [#allocation7]  }
  0x29   :  { %52 = vadd.xlane.f32.xlu0 %v51_v2  ;;  %v71_v7 = vsel %vm50_vm0, %v70_v5, 0.0  ;;  %v59_v8 = vsel %vm50_vm0, %v58_v6, 0.0  ;;  %v94_v12 = vmul.f32 %v360_v10, %v360_v10  ;;  %v371_v15 = vld [vmem:[%s407_s4] sm:$0xf]  ;;  %s167_s4 = sshll.u32 %s278_s3, 4  ;;  %s168_s4 = int_to_ptr.vmem [resolvable:$true] %s167_s4 }
  0x2a   :  { %72 = vadd.xlane.f32.xlu1 %v71_v7  ;;  %v83_v13 = vsel %vm50_vm0, %v82_v11, 0.0  ;;  %v106_v16 = vmul.f32 %v371_v15, %v371_v15  ;;  %s248_s25 = scalar_lea.vmem %s168_s4, 64  ;;  %p253_p3 = scmp.lt.s32.totalorder %s168_s4, %s168_s4 }
  0x2b   :  { %v95_v14 = vsel %vm50_vm0, %v94_v12, 0.0  ;;  %p249_p2 = scmp.ne.s32.totalorder %s168_s4, %s248_s25  ;;  %p254_p4 = scmp.lt.s32.totalorder %s248_s25, %s248_s25 }
  0x2c   :  { %v107_v17 = vsel %vm50_vm0, %v106_v16, 0.0 }
  0x2d   :  { %60 = vadd.xlane.f32.xlu0 %v59_v8  ;;  %p255_p5 = por %p254_p4, %p253_p3 }
  0x2e   :  { %84 = vadd.xlane.f32.xlu1 %v83_v13 }
  0x2f   :  { %p256_p6 = pnand %p255_p5, %p249_p2 }
  0x31   :  { %96 = vadd.xlane.f32.xlu0 %v95_v14 }
  0x32   :  { %108 = vadd.xlane.f32.xlu1 %v107_v17 }
  0xb6   :  { %v53_v18 = vpop.xlane.xlu0 %52 }
  0xb7   :  { %v54_v19 = vmax.f32 %v53_v18, 1e-24  ;;  %v73_v32 = vpop.xlane.xlu1 %72 }
  0xb8   :  { %v74_v34 = vmax.f32 %v73_v32, 1e-24 }
  0xb9   :  { %180 = vrsqrt.f32 %v54_v19 }
  0xba   :  { %v61_v33 = vpop.xlane.xlu0 %60  ;;  %182 = vrsqrt.f32 %v74_v34 }
  0xbb   :  { %v85_v35 = vpop.xlane.xlu1 %84  ;;  %v62_v36 = vmax.f32 %v61_v33, 1e-24 }
  0xbc   :  { %v86_v38 = vmax.f32 %v85_v35, 1e-24 }
  0xbd   :  { %184 = vrsqrt.f32 %v62_v36 }
  0xbe   :  { %v97_v37 = vpop.xlane.xlu0 %96  ;;  %186 = vrsqrt.f32 %v86_v38 }
  0xbf   :  { %v109_v39 = vpop.xlane.xlu1 %108  ;;  %v98_v40 = vmax.f32 %v97_v37, 1e-24 }
  0xc0   :  { %v110_v41 = vmax.f32 %v109_v39, 1e-24 }
  0xc1   :  { %188 = vrsqrt.f32 %v98_v40 }
  0xc2   :  { %190 = vrsqrt.f32 %v110_v41 }
  0xc3   :  { %v181_v20 = vpop.eup %180 }
  0xc4   :  { %v56_v21 = vmul.f32 %v181_v20, %v48_v0  ;;  %v183_v42 = vpop.eup %182 }
  0xc6   :  { %v76_v22 = vmul.f32 %v342_v3, %v56_v21  ;;  %v64_v23 = vmul.f32 %v344_v4, %v56_v21  ;;  %v100_v26 = vmul.f32 %v360_v10, %v56_v21  ;;  %v88_v27 = vmul.f32 %v355_v9, %v56_v21 }
  0xc7   :  { %v112_v30 = vmul.f32 %v371_v15, %v56_v21  ;;  %v185_v43 = vpop.eup %184 }
  0xc8   :  { %v77_v24 = vsel %vm50_vm0, %v76_v22, 0.0  ;;  %v65_v25 = vsel %vm50_vm0, %v64_v23, 0.0  ;;  %v101_v28 = vsel %vm50_vm0, %v100_v26, 0.0  ;;  %v89_v29 = vsel %vm50_vm0, %v88_v27, 0.0  ;;  %v187_v48 = vpop.eup %186 }
  0xc9   :  { %78 = vadd.xlane.f32.xlu1 %v77_v24  ;;  %66 = vadd.xlane.f32.xlu0 %v65_v25  ;;  %v113_v31 = vsel %vm50_vm0, %v112_v30, 0.0 }
  0xcb   :  { %v189_v49 = vpop.eup %188 }
  0xcc   :  { %v191_v54 = vpop.eup %190 }
  0xcd   :  { %102 = vadd.xlane.f32.xlu1 %v101_v28  ;;  %90 = vadd.xlane.f32.xlu0 %v89_v29 }
  0xd1   :  { %114 = vadd.xlane.f32.xlu0 %v113_v31 }
 0x156   :  { %v79_v44 = vpop.xlane.xlu1 %78  ;;  %v67_v45 = vpop.xlane.xlu0 %66 }
 0x157   :  { %v80_v46 = vmul.f32 %v183_v42, %v79_v44  ;;  %v68_v47 = vmul.f32 %v185_v43, %v67_v45 }
 0x159   :  { %v117_v52 = vmax.f32 %v68_v47, %v80_v46 }
 0x15a   :  { %v103_v50 = vpop.xlane.xlu1 %102  ;;  %v91_v51 = vpop.xlane.xlu0 %90 }
 0x15b   :  { %v92_v53 = vmul.f32 %v187_v48, %v91_v51  ;;  %v104_v55 = vmul.f32 %v189_v49, %v103_v50 }
 0x15d   :  { %v118_v56 = vmax.f32 %v117_v52, %v92_v53 }
 0x15e   :  { %v115_v57 = vpop.xlane.xlu0 %114 }
 0x15f   :  { %v119_v58 = vmax.f32 %v118_v56, %v104_v55  ;;  %v116_v59 = vmul.f32 %v191_v54, %v115_v57 }
 0x161   :  { %v120_v60 = vmax.f32 %v119_v58, %v116_v59 }
 0x163   :  { %v121_v61 = vsub.f32 %v68_v47, %v120_v60  ;;  %v124_v62 = vsub.f32 %v80_v46, %v120_v60  ;;  %v127_v63 = vsub.f32 %v92_v53, %v120_v60  ;;  %v130_v0 = vsub.f32 %v104_v55, %v120_v60 }
 0x164   :  { %v133_v6 = vsub.f32 %v116_v59, %v120_v60 }
 0x165   :  { %v122_v1 = vmul.f32 1.442695, %v121_v61  ;;  %v125_v2 = vmul.f32 1.442695, %v124_v62  ;;  %v128_v5 = vmul.f32 1.442695, %v127_v63 }
 0x166   :  { %v131_v7 = vmul.f32 1.442695, %v130_v0  ;;  %v134_v8 = vmul.f32 1.442695, %v133_v6 }
 0x167   :  { %192 = vpow2.f32 %v122_v1 }
 0x168   :  { %194 = vpow2.f32 %v125_v2 }
 0x169   :  { %196 = vpow2.f32 %v128_v5 }
 0x16a   :  { %198 = vpow2.f32 %v131_v7 }
 0x16b   :  { %200 = vpow2.f32 %v134_v8 }
 0x171   :  { %v193_v11 = vpop.eup %192 }
 0x172   :  { %v195_v12 = vpop.eup %194 }
 0x173   :  { %v136_v13 = vadd.f32 %v195_v12, %v193_v11  ;;  %v197_v14 = vpop.eup %196 }
 0x174   :  { %v199_v17 = vpop.eup %198 }
 0x175   :  { %v137_v16 = vadd.f32 %v197_v14, %v136_v13  ;;  %v201_v19 = vpop.eup %200 }
 0x177   :  { %v138_v18 = vadd.f32 %v199_v17, %v137_v16 }
 0x179   :  { %v139_v20 = vadd.f32 %v201_v19, %v138_v18 }
 0x17b   :  { %202 = vrcp.f32 %v139_v20 }
 0x185   :  { %v203_v21 = vpop.eup %202 }
 0x186   :  { %v141_v22 = vmul.f32 %v203_v21, %v193_v11  ;;  %v144_v23 = vmul.f32 %v203_v21, %v195_v12  ;;  %v148_v24 = vmul.f32 %v203_v21, %v197_v14  ;;  %v152_v25 = vmul.f32 %v203_v21, %v199_v17 }
 0x187   :  { %v156_v29 = vmul.f32 %v203_v21, %v201_v19 }
 0x188   :  { %v142_v26 = vmul.f32 %v185_v43, %v141_v22  ;;  %v145_v27 = vmul.f32 %v183_v42, %v144_v23  ;;  %v149_v28 = vmul.f32 %v187_v48, %v148_v24  ;;  %v153_v32 = vmul.f32 %v189_v49, %v152_v25 }
 0x189   :  { %v157_v35 = vmul.f32 %v191_v54, %v156_v29 }
 0x18a   :  { %v143_v30 = vmul.f32 %v142_v26, %v344_v4  ;;  %v146_v31 = vmul.f32 %v145_v27, %v342_v3  ;;  %v150_v34 = vmul.f32 %v149_v28, %v355_v9  ;;  %v154_v37 = vmul.f32 %v153_v32, %v360_v10 }
 0x18b   :  { %v158_v39 = vmul.f32 %v157_v35, %v371_v15 }
 0x18c   :  { %v147_v33 = vadd.f32 %v146_v31, %v143_v30 }
 0x18e   :  { %v151_v36 = vadd.f32 %v150_v34, %v147_v33 }
 0x190   :  { %v155_v38 = vadd.f32 %v154_v37, %v151_v36 }
 0x192   :  { %v159_v40 = vadd.f32 %v158_v39, %v155_v38 }
 0x194   :  { %160 = vst [vmem:[#allocation7] sm:$0xf] %v159_v40 }
 0x195   :  { %259 = shalt.err (!%p256_p6)
}
 0x196   :  { %s260_s28 = scalar_lea.hbm %s409_s6, 64 }
 0x197   :  { %p261_p7 = scmp.ne.s32.totalorder %s409_s6, %s260_s28  ;;  %p264_p8 = scmp.lt.u32.totalorder %s260_s28, %s409_s6 }
 0x199   :  { %p266_p9 = pnand %p264_p8, %p261_p7 }
 0x19b   :  { %269 = shalt.err (!%p266_p9)
}
 0x19c   :  { %170 = dma.vmem_to_hbm [thread:$0]  %s168_s4, 64, %s409_s6, [#allocation4]  }
 0x19d   :  { %274 = dma.done.wait [#allocation4], 64  }
 0x19e   :  { %275 = vsyncadd [#allocation4], 4294967232 }
 0x19f   :  { %174 = vsyncpa [#allocation3], 1 }
 0x1a0   :  { %175 = vsyncpa [#allocation6], 1 }
 0x1a1   :  { %176 = vsyncpa [#allocation4], 1 }

</bundles_post_ra>
